<compile_context>
chip_gen: v6e
topology: v6e:2x2x1
jax: 0.10.0
libtpu: 0.0.40
codegen_flags: <defaults>
</compile_context>

<pallas_src>
import jax
import jax.numpy as jnp
import numpy as np
from jax.experimental import pallas as pl
from jax.experimental.pallas import tpu as pltpu


def _leaky_relu(x, slope=0.2):
    return jnp.where(x > 0, x, slope * x)


def _round_up(x, m):
    return ((x + m - 1) // m) * m


def _choose_block_m(B, requested):
    """Pick the batch tile.

    B <= 128: one un-padded tile (block dims equal to full array dims are legal).
    B  > 128: 128-aligned tiles, capped near ceil(B/4) so the 'parallel' axis
    has >=4 grid steps (shards across v7x's two TensorCores) while remaining
    large enough to amortize the ~0.35us/step pipeline overhead on v5e/v6e.
    """
    if B <= 128:
        return B, B
    block_m = min(requested, _round_up(pl.cdiv(B, 4), 128))
    block_m = max(block_m, 128)
    return block_m, _round_up(B, block_m)


def _vmem_limit_bytes(block_m, D, H):
    bf16, f32 = 2, 4
    needed = (
        2 * block_m * D * bf16       # x tile, double-buffered, bf16
        + 2 * (D * H + H * H) * bf16 # w1 + w2 (allow for double buffers)
        + 2 * 3 * H * f32            # b1, b2, w3 row
        + 2 * block_m * f32          # out tile, double-buffered
    )
    # 2x headroom for Mosaic internal scratch; floor at 32 MiB (lifts v5e's
    # 16 MiB scoped default), cap at 64 MiB so the budget is valid on v7x too.
    return int(min(max(2 * needed, 32 * 1024 * 1024), 64 * 1024 * 1024))


def discriminator_kernel(x_ref, w1_ref, b1_ref, w2_ref, b2_ref, w3_ref, b3_ref,
                         o_ref):
    # x_ref : (block_m, D) bf16      (streamed per grid step, pre-cast in wrapper)
    # w1_ref: (D, 512) bf16          (VMEM-resident across the grid)
    # b1_ref: (1, 512) f32
    # w2_ref: (512, 512) bf16        (VMEM-resident)
    # b2_ref: (1, 512) f32
    # w3_ref: (1, 512) f32           (final layer as a row vector)
    # b3_ref: (1, 1) f32 in SMEM     (scalar)
    # o_ref : (block_m, 1) f32
    x = x_ref[...]

    # Layer 1: MXU matmul in bf16 with f32 accumulation; bias + LeakyReLU in f32.
    h1 = jnp.dot(x, w1_ref[...], preferred_element_type=jnp.float32) + b1_ref[...]
    h1 = _leaky_relu(h1)

    # Layer 2.
    h2 = jnp.dot(h1.astype(jnp.bfloat16), w2_ref[...],
                 preferred_element_type=jnp.float32) + b2_ref[...]
    h2 = _leaky_relu(h2)

    # Layer 3 (512 -> 1): VPU multiply + XLU cross-lane reduction instead of an
    # N=1 MXU pass (which would fill 1 of 128/256 output lanes).
    out = jnp.sum(h2 * w3_ref[...], axis=-1, keepdims=True) + b3_ref[0, 0]
    o_ref[...] = out.astype(o_ref.dtype)


def discriminator_forward(img, params, *, block_m=512):
    """img: (B, C, L, 257) float32, NCHW as in PyTorch."""
    B = img.shape[0]
    x_flat = img.reshape(B, -1)            # identical to torch .view(B, -1)
    D = x_flat.shape[1]
    w1, b1, w2, b2, w3, b3 = params
    H = w1.shape[1]                        # 512

    # bf16 streamed activations: halves x's HBM->VMEM DMA and its double buffer.
    x_bf = x_flat.astype(jnp.bfloat16)

    block_m, B_pad = _choose_block_m(B, block_m)
    if B_pad != B:
        # Small bf16 pad of the batch only (padded rows produce bias-driven
        # garbage that is sliced off after the call).  No padding of D.
        x_bf = jnp.pad(x_bf, ((0, B_pad - B), (0, 0)))
    grid = (B_pad // block_m,)

    # bf16 weights for the two MXU layers (halves the one-time weight DMA).
    w1_bf = w1.astype(jnp.bfloat16)
    w2_bf = w2.astype(jnp.bfloat16)
    b1_f = b1.reshape(1, H).astype(jnp.float32)
    b2_f = b2.reshape(1, H).astype(jnp.float32)
    w3_row = w3.reshape(1, H).astype(jnp.float32)   # final layer as a row vector
    b3_s = b3.reshape(1, 1).astype(jnp.float32)     # scalar bias -> SMEM

    def resident(shape):
        # Same block index every grid step -> DMA'd once, stays in VMEM.
        return pl.BlockSpec(shape, lambda i: (0, 0))

    out = pl.pallas_call(
        discriminator_kernel,
        out_shape=jax.ShapeDtypeStruct((B_pad, 1), jnp.float32),
        grid=grid,
        in_specs=[
            pl.BlockSpec((block_m, D), lambda i: (i, 0)),       # x: streamed
            resident((D, H)),                                   # w1
            resident((1, H)),                                   # b1
            resident((H, H)),                                   # w2
            resident((1, H)),                                   # b2
            resident((1, H)),                                   # w3 row
            pl.BlockSpec(memory_space=pltpu.MemorySpace.SMEM),  # b3 scalar
        ],
        out_specs=pl.BlockSpec((block_m, 1), lambda i: (i, 0)),
        compiler_params=pltpu.CompilerParams(
            dimension_semantics=("parallel",),        # shard batch over v7x's 2 TCs
            vmem_limit_bytes=_vmem_limit_bytes(block_m, D, H),
        ),
    )(x_bf, w1_bf, b1_f, w2_bf, b2_f, w3_row, b3_s)

    return out[:B]


def init_params(key, in_dim, hidden=512, out_dim=1):
    """Deterministic init mimicking nn.Linear default (uniform +/- 1/sqrt(fan_in))."""
    ks = jax.random.split(key, 6)

    def linear(kw, kb, fan_in, fan_out):
        bound = 1.0 / np.sqrt(fan_in)
        w = jax.random.uniform(kw, (fan_in, fan_out), jnp.float32, -bound, bound)
        b = jax.random.uniform(kb, (1, fan_out), jnp.float32, -bound, bound)
        return w, b

    w1, b1 = linear(ks[0], ks[1], in_dim, hidden)
    w2, b2 = linear(ks[2], ks[3], hidden, hidden)
    w3, b3 = linear(ks[4], ks[5], hidden, out_dim)
    return (w1, b1, w2, b2, w3, b3)


def reference_forward(img, params):
    """Pure-JAX reference using the same precision recipe as the kernel
    (bf16 MXU inputs for layers 1-2, f32 accumulation / bias / LeakyReLU,
    f32 reduction for the 512->1 layer)."""
    B = img.shape[0]
    x = img.reshape(B, -1).astype(jnp.bfloat16)
    w1, b1, w2, b2, w3, b3 = params
    h1 = _leaky_relu(jnp.dot(x, w1.astype(jnp.bfloat16),
                             preferred_element_type=jnp.float32) + b1)
    h2 = _leaky_relu(jnp.dot(h1.astype(jnp.bfloat16), w2.astype(jnp.bfloat16),
                             preferred_element_type=jnp.float32) + b2)
    # Mathematically identical to h2 @ w3 + b3.
    return jnp.sum(h2 * w3.reshape(1, -1), axis=-1, keepdims=True) + b3.reshape(1, 1)


if __name__ == "__main__":
    # Small shapes consistent with img_shape = (channels, data_len, 257):
    # batch=2, channels=1, data_len=2  ->  flattened dim = 1*2*257 = 514
    B, C, L, W = 2, 1, 2, 257
    in_dim = C * L * W

    key = jax.random.PRNGKey(0)
    k_img, k_params = jax.random.split(key)

    img = jax.random.normal(k_img, (B, C, L, W), dtype=jnp.float32)
    params = init_params(k_params, in_dim)

    out = discriminator_forward(img, params)
    out = jax.block_until_ready(out)

    ref = reference_forward(img, params)
    np.testing.assert_allclose(np.asarray(out), np.asarray(ref),
                               rtol=2e-3, atol=2e-3)
    assert out.shape == (B, 1)

    print("KERNEL_OK")
</pallas_src>

<mosaic_0001>
module attributes {stable_mosaic.version = 11 : i64} {
  func.func @discriminator_kernel(%arg0: i32, %arg1: memref<2x514xbf16, #tpu.memory_space<vmem>>, %arg2: memref<514x512xbf16, #tpu.memory_space<vmem>>, %arg3: memref<1x512xf32, #tpu.memory_space<vmem>>, %arg4: memref<512x512xbf16, #tpu.memory_space<vmem>>, %arg5: memref<1x512xf32, #tpu.memory_space<vmem>>, %arg6: memref<1x512xf32, #tpu.memory_space<vmem>>, %arg7: memref<1x1xf32, #tpu.memory_space<smem>>, %arg8: memref<2x1xf32, #tpu.memory_space<vmem>>) attributes {dimension_semantics = [#tpu.dimension_semantics<parallel>], iteration_bounds = array<i64: 1>, scalar_prefetch = 0 : i64, scratch_operands = 0 : i64, tpu.core_type = #tpu.core_type<tc>, window_params = [{transform_indices = @transform_0, window_bounds = array<i64: 2, 514>}, {pipeline_mode = #tpu.pipeline_mode<synchronous>, transform_indices = @transform_1, window_bounds = array<i64: 514, 512>}, {pipeline_mode = #tpu.pipeline_mode<synchronous>, transform_indices = @transform_2, window_bounds = array<i64: 1, 512>}, {pipeline_mode = #tpu.pipeline_mode<synchronous>, transform_indices = @transform_3, window_bounds = array<i64: 512, 512>}, {pipeline_mode = #tpu.pipeline_mode<synchronous>, transform_indices = @transform_4, window_bounds = array<i64: 1, 512>}, {pipeline_mode = #tpu.pipeline_mode<synchronous>, transform_indices = @transform_5, window_bounds = array<i64: 1, 512>}, {transform_indices = @transform_6, window_bounds = array<i64: 1, 1>}, {transform_indices = @transform_7, window_bounds = array<i64: 2, 1>}]} {
    %c0 = arith.constant 0 : index
    %c0_0 = arith.constant 0 : index
    %0 = vector.load %arg1[%c0, %c0_0] : memref<2x514xbf16, #tpu.memory_space<vmem>>, vector<2x514xbf16>
    %c0_1 = arith.constant 0 : index
    %c0_2 = arith.constant 0 : index
    %1 = vector.load %arg2[%c0_1, %c0_2] : memref<514x512xbf16, #tpu.memory_space<vmem>>, vector<514x512xbf16>
    %cst = arith.constant dense<0.000000e+00> : vector<2x512xf32>
    %2 = tpu.matmul %0, %1, %cst {dimension_numbers = #tpu.dot_dimension_numbers<[1], [0], [0], [1], [0, 0, 1, 1], [], []>} : vector<2x514xbf16>, vector<514x512xbf16>, vector<2x512xf32> -> vector<2x512xf32>
    %c0_3 = arith.constant 0 : index
    %c0_4 = arith.constant 0 : index
    %3 = vector.load %arg3[%c0_3, %c0_4] : memref<1x512xf32, #tpu.memory_space<vmem>>, vector<1x512xf32>
    %4 = vector.broadcast %3 : vector<1x512xf32> to vector<2x512xf32>
    %5 = arith.addf %2, %4 : vector<2x512xf32>
    %cst_5 = arith.constant 0.000000e+00 : f32
    %6 = vector.broadcast %cst_5 : f32 to vector<2x512xf32>
    %7 = arith.cmpf ogt, %5, %6 : vector<2x512xf32>
    %cst_6 = arith.constant 2.000000e-01 : f32
    %8 = vector.broadcast %cst_6 : f32 to vector<2x512xf32>
    %9 = arith.mulf %8, %5 : vector<2x512xf32>
    %10 = arith.select %7, %5, %9 : vector<2x512xi1>, vector<2x512xf32>
    %11 = arith.truncf %10 : vector<2x512xf32> to vector<2x512xbf16>
    %c0_7 = arith.constant 0 : index
    %c0_8 = arith.constant 0 : index
    %12 = vector.load %arg4[%c0_7, %c0_8] : memref<512x512xbf16, #tpu.memory_space<vmem>>, vector<512x512xbf16>
    %cst_9 = arith.constant dense<0.000000e+00> : vector<2x512xf32>
    %13 = tpu.matmul %11, %12, %cst_9 {dimension_numbers = #tpu.dot_dimension_numbers<[1], [0], [0], [1], [0, 0, 1, 1], [], []>} : vector<2x512xbf16>, vector<512x512xbf16>, vector<2x512xf32> -> vector<2x512xf32>
    %c0_10 = arith.constant 0 : index
    %c0_11 = arith.constant 0 : index
    %14 = vector.load %arg5[%c0_10, %c0_11] : memref<1x512xf32, #tpu.memory_space<vmem>>, vector<1x512xf32>
    %15 = vector.broadcast %14 : vector<1x512xf32> to vector<2x512xf32>
    %16 = arith.addf %13, %15 : vector<2x512xf32>
    %cst_12 = arith.constant 0.000000e+00 : f32
    %17 = vector.broadcast %cst_12 : f32 to vector<2x512xf32>
    %18 = arith.cmpf ogt, %16, %17 : vector<2x512xf32>
    %cst_13 = arith.constant 2.000000e-01 : f32
    %19 = vector.broadcast %cst_13 : f32 to vector<2x512xf32>
    %20 = arith.mulf %19, %16 : vector<2x512xf32>
    %21 = arith.select %18, %16, %20 : vector<2x512xi1>, vector<2x512xf32>
    %c0_14 = arith.constant 0 : index
    %c0_15 = arith.constant 0 : index
    %22 = vector.load %arg6[%c0_14, %c0_15] : memref<1x512xf32, #tpu.memory_space<vmem>>, vector<1x512xf32>
    %23 = vector.broadcast %22 : vector<1x512xf32> to vector<2x512xf32>
    %24 = arith.mulf %21, %23 : vector<2x512xf32>
    %cst_16 = arith.constant dense<0.000000e+00> : vector<2xf32>
    %25 = vector.multi_reduction <add>, %24, %cst_16 [1] : vector<2x512xf32> to vector<2xf32>
    %26 = vector.shape_cast %25 : vector<2xf32> to vector<2x1xf32>
    %c0_17 = arith.constant 0 : index
    %c0_18 = arith.constant 0 : index
    %27 = memref.load %arg7[%c0_17, %c0_18] : memref<1x1xf32, #tpu.memory_space<smem>>
    %28 = vector.broadcast %27 : f32 to vector<2x1xf32>
    %29 = arith.addf %26, %28 : vector<2x1xf32>
    %c0_19 = arith.constant 0 : index
    %c0_20 = arith.constant 0 : index
    %30 = vector.load %arg8[%c0_19, %c0_20] : memref<2x1xf32, #tpu.memory_space<vmem>>, vector<2x1xf32>
    tpu.vector_store %arg8[%c0_19, %c0_20], %29 {strides = array<i32>} : memref<2x1xf32, #tpu.memory_space<vmem>>, vector<2x1xf32>,
    return
  }
  func.func @transform_0(%arg0: i32) -> (i32, i32) {
    %c0_i32 = arith.constant 0 : i32
    %c0_i32_0 = arith.constant 0 : i32
    return %arg0, %c0_i32 : i32, i32
  }
  func.func @transform_1(%arg0: i32) -> (i32, i32) {
    %c0_i32 = arith.constant 0 : i32
    %c0_i32_0 = arith.constant 0 : i32
    %c0_i32_1 = arith.constant 0 : i32
    return %c0_i32, %c0_i32_0 : i32, i32
  }
  func.func @transform_2(%arg0: i32) -> (i32, i32) {
    %c0_i32 = arith.constant 0 : i32
    %c0_i32_0 = arith.constant 0 : i32
    %c0_i32_1 = arith.constant 0 : i32
    return %c0_i32, %c0_i32_0 : i32, i32
  }
  func.func @transform_3(%arg0: i32) -> (i32, i32) {
    %c0_i32 = arith.constant 0 : i32
    %c0_i32_0 = arith.constant 0 : i32
    %c0_i32_1 = arith.constant 0 : i32
    return %c0_i32, %c0_i32_0 : i32, i32
  }
  func.func @transform_4(%arg0: i32) -> (i32, i32) {
    %c0_i32 = arith.constant 0 : i32
    %c0_i32_0 = arith.constant 0 : i32
    %c0_i32_1 = arith.constant 0 : i32
    return %c0_i32, %c0_i32_0 : i32, i32
  }
  func.func @transform_5(%arg0: i32) -> (i32, i32) {
    %c0_i32 = arith.constant 0 : i32
    %c0_i32_0 = arith.constant 0 : i32
    %c0_i32_1 = arith.constant 0 : i32
    return %c0_i32, %c0_i32_0 : i32, i32
  }
  func.func @transform_6(%arg0: i32) -> (i32, i32) {
    %c0_i32 = arith.constant 0 : i32
    %c0_i32_0 = arith.constant 0 : i32
    %c0_i32_1 = arith.constant 0 : i32
    return %c0_i32, %c0_i32_0 : i32, i32
  }
  func.func @transform_7(%arg0: i32) -> (i32, i32) {
    %c0_i32 = arith.constant 0 : i32
    %c0_i32_0 = arith.constant 0 : i32
    return %arg0, %c0_i32 : i32, i32
  }
}

</mosaic_0001>

<bundles_post_ra>
// kernel: tpu_custom_call.1
= control target key start
LH: loop header
LB: loop body
LE: loop exit
PB: predicated region body
PF: predicated region fallthrough
CT: control target
= control target key end

     0   :  { %13 = vsyncpa [#allocation4], 0  ;;  %s3116_s0 = inlined_call_operand.hbm [shape: bf16[2,514], index: 0, kind: input, shape index: {}]   ;;  %s3117_s1 = inlined_call_operand.hbm [shape: bf16[514,512], index: 1, kind: input, shape index: {}]   ;;  %s3118_s2 = inlined_call_operand.vmem [shape: f32[1,512], index: 2, kind: input, shape index: {}]   ;;  %s3119_s3 = inlined_call_operand.hbm [shape: bf16[512,512], index: 3, kind: input, shape index: {}]   ;;  %s3120_s4 = inlined_call_operand.vmem [shape: f32[1,512], index: 4, kind: input, shape index: {}]   ;;  %s3121_s5 = inlined_call_operand.hbm [shape: f32[1,512], index: 5, kind: input, shape index: {}]   ;;  %s3122_s6 = inlined_call_operand.<no memory space> [shape: f32[1,1], index: 6, kind: input, shape index: {}]   ;;  %s3123_s7 = inlined_call_operand.vmem [shape: f32[2,1], index: 7, kind: output, shape index: {}]  }
   0x1   :  { %14 = vsyncpa [#allocation6], 0 }
   0x2   :  { %15 = vsyncpa [#allocation9], 0  ;;  %s2966_s24 = smov [#allocation5]  }
   0x3   :  { %s31_s25 = sshll.u32 %s2966_s24, 4  ;;  %s32_s25 = int_to_ptr.vmem [resolvable:$true] %s31_s25 }
   0x4   :  { %s2888_s26 = scalar_lea.vmem %s32_s25, 16640  ;;  %p2893_p1 = scmp.lt.s32.totalorder %s32_s25, %s32_s25 }
   0x5   :  { %p2889_p0 = scmp.ne.s32.totalorder %s32_s25, %s2888_s26  ;;  %p2894_p2 = scmp.lt.s32.totalorder %s2888_s26, %s2888_s26 }
   0x7   :  { %p2895_p3 = por %p2894_p2, %p2893_p1 }
   0x9   :  { %p2896_p4 = pnand %p2895_p3, %p2889_p0 }
   0xb   :  { %2899 = shalt.err (!%p2896_p4)
}
   0xc   :  { %s2967_s27 = smov 256   ;;  %s2968_s28 = smov 16  }
   0xd   :  { %37 = dma.hbm_to_vmem [thread:$0]  %s3117_s1, 16640, %s32_s25, [#allocation6], %s2967_s27, %s2967_s27, %s2968_s28  }
   0xe   :  { %s2969_s8 = smov [#allocation3]   ;;  %s2970_s10 = smov [#allocation7]  }
   0xf   :  { %s22_s9 = sshll.u32 %s2969_s8, 4  ;;  %s45_s11 = sshll.u32 %s2970_s10, 4  ;;  %s23_s9 = int_to_ptr.vmem [resolvable:$true] %s22_s9  ;;  %s46_s11 = int_to_ptr.vmem [resolvable:$true] %s45_s11 }
  0x10   :  { %s2908_s12 = scalar_lea.vmem %s23_s9, 80  ;;  %s2912_s13 = scalar_lea.vmem %s23_s9, 96 }
  0x11   :  { %p2909_p5 = scmp.ne.s32.totalorder %s23_s9, %s2908_s12  ;;  %p2913_p6 = scmp.lt.s32.totalorder %s23_s9, %s23_s9 }
  0x12   :  { %p2914_p7 = scmp.lt.s32.totalorder %s2912_s13, %s2908_s12 }
  0x14   :  { %p2915_p8 = por %p2914_p7, %p2913_p6 }
  0x16   :  { %p2916_p9 = pnand %p2915_p8, %p2909_p5 }
  0x18   :  { %2919 = shalt.err (!%p2916_p9)
}
  0x19   :  { %25 = dma.hbm_to_vmem [thread:$0]  %s3116_s0, 80, %s23_s9, [#allocation4]  }
  0x1a   :  { %s2928_s16 = scalar_lea.vmem %s46_s11, 16384  ;;  %p2933_p11 = scmp.lt.s32.totalorder %s46_s11, %s46_s11 }
  0x1b   :  { %p2929_p10 = scmp.ne.s32.totalorder %s46_s11, %s2928_s16  ;;  %p2934_p12 = scmp.lt.s32.totalorder %s2928_s16, %s2928_s16 }
  0x1d   :  { %p2935_p13 = por %p2934_p12, %p2933_p11 }
  0x1f   :  { %p2936_p0 = pnand %p2935_p13, %p2929_p10 }
  0x21   :  { %2939 = shalt.err (!%p2936_p0)
}
  0x22   :  { %51 = dma.hbm_to_vmem [thread:$0]  %s3119_s3, 16384, %s46_s11, [#allocation6], %s2967_s27, %s2967_s27, %s2968_s28  }
  0x23   :  { %s2971_s18 = smov [#allocation8]  }
  0x24   :  { %s60_s19 = sshll.u32 %s2971_s18, 4  ;;  %s61_s19 = int_to_ptr.vmem [resolvable:$true] %s60_s19 }
  0x25   :  { %s2948_s20 = scalar_lea.vmem %s61_s19, 64  ;;  %p2953_p2 = scmp.lt.s32.totalorder %s61_s19, %s61_s19 }
  0x26   :  { %p2949_p1 = scmp.ne.s32.totalorder %s61_s19, %s2948_s20  ;;  %p2954_p3 = scmp.lt.s32.totalorder %s2948_s20, %s2948_s20 }
  0x28   :  { %p2955_p4 = por %p2954_p3, %p2953_p2 }
  0x2a   :  { %p2956_p5 = pnand %p2955_p4, %p2949_p1 }
  0x2c   :  { %2959 = shalt.err (!%p2956_p5)
}
  0x2d   :  { %63 = dma.hbm_to_vmem [thread:$0]  %s3121_s5, 64, %s61_s19, [#allocation9]  }
  0x2e   :  { %2960 = dma.done.wait [#allocation4], 80  }
  0x2f   :  { %2961 = vsyncadd [#allocation4], 4294967216 }
  0x30   :  { %2962 = dma.done.wait [#allocation6], 33024  }
  0x31   :  { %2963 = vsyncadd [#allocation6], 4294934272 }
  0x32   :  { %2964 = dma.done.wait [#allocation9], 64  }
  0x33   :  { %2965 = vsyncadd [#allocation9], 4294967232  ;;  %v2491_v0 = vld [vmem:[#allocation5 + $0xe4] ss:$16 sps:$4 sm:$0xff]   ;;  %v2495_v2 = vld [vmem:[#allocation5 + $0xe0] ss:$16 sps:$4 sm:$0xff]   ;;  %v212_v36 = vlaneseq }
  0x34   :  { %v2493_v1 = vld [vmem:[#allocation5 + $0x2e4] ss:$16 sps:$4 sm:$0xff]   ;;  %943 = vmatprep.subr.bf16.mxu0 %v2491_v0  ;;  %v2496_v3 = vld [vmem:[#allocation5 + $0x2e0] ss:$16 sps:$4 sm:$0xff]   ;;  %v2972_v37 = vmov 1966171168  }
  0x35   :  { %984 = vmatprep.subr.bf16.mxu1 %v2493_v1  ;;  %v2497_v4 = vld [vmem:[#allocation5 + $0xc4] ss:$16 sps:$4 sm:$0xff]   ;;  %944 = vmatpush1.bf16.msra.mxu0 %v2495_v2  ;;  %v2501_v6 = vld [vmem:[#allocation5 + $0xc0] ss:$16 sps:$4 sm:$0xff]   ;;  %v235_v38 = vunpack.c.l.s4 %v2972_v37  ;;  %v3026_v42 = vshrl.u32 %v212_v36, 7  ;;  %vm930_vm0 = vcmask 1040384  }
  0x36   :  { %985 = vmatpush1.bf16.msra.mxu1 %v2496_v3  ;;  %v2499_v5 = vld [vmem:[#allocation5 + $0x2c4] ss:$16 sps:$4 sm:$0xff]   ;;  %945 = vmatprep.subr.bf16.mxu0 %v2497_v4  ;;  %v2502_v7 = vld [vmem:[#allocation5 + $0x2c0] ss:$16 sps:$4 sm:$0xff]   ;;  %v79_v52 = vld [vmem:[#allocation3] sm:$0x1f] }
  0x37   :  { %986 = vmatprep.subr.bf16.mxu1 %v2499_v5  ;;  %v2503_v8 = vld [vmem:[#allocation5 + $0xa4] ss:$16 sps:$4 sm:$0xff]   ;;  %v2507_v10 = vld [vmem:[#allocation5 + $0xa0] ss:$16 sps:$4 sm:$0xff]   ;;  %v236_v43 = vunpack.c.0.s8 %v235_v38  ;;  %vm926_vm1 = vcmask 15360   ;;  %vm2197_vm8 = vcmask 1041408  }
  0x38   :  { %v2505_v9 = vld [vmem:[#allocation5 + $0x2a4] ss:$16 sps:$4 sm:$0xff]   ;;  %v2508_v11 = vld [vmem:[#allocation5 + $0x2a0] ss:$16 sps:$4 sm:$0xff]   ;;  %v2611_v36 = vld [vmem:[#allocation5 + $0x68] ss:$16 sps:$4 sm:$0xff]  }
  0x39   :  { %946 = vmatpush1.bf16.msra.mxu0 %v2501_v6  ;;  %v2509_v12 = vld [vmem:[#allocation5 + $0x84] ss:$16 sps:$4 sm:$0xff]   ;;  %v2513_v14 = vld [vmem:[#allocation5 + $0x80] ss:$16 sps:$4 sm:$0xff]   ;;  %v3029_v49 = vsub.s32 %v236_v43, %v3026_v42  ;;  %v2616_v37 = vld [vmem:[#allocation5 + $0x28c] ss:$16 sps:$4 sm:$0xff]  }
  0x3a   :  { %987 = vmatpush1.bf16.msra.mxu1 %v2502_v7  ;;  %947 = vmatprep.subr.bf16.mxu0 %v2503_v8  ;;  %v2511_v13 = vld [vmem:[#allocation5 + $0x284] ss:$16 sps:$4 sm:$0xff]   ;;  %v2514_v15 = vld [vmem:[#allocation5 + $0x280] ss:$16 sps:$4 sm:$0xff]   ;;  %v2619_v38 = vld [vmem:[#allocation5 + $0x4c] ss:$16 sps:$4 sm:$0xff]  }
  0x3b   :  { %988 = vmatprep.subr.bf16.mxu1 %v2505_v9  ;;  %v2515_v16 = vld [vmem:[#allocation5 + $0x64] ss:$16 sps:$4 sm:$0xff]   ;;  %v2519_v18 = vld [vmem:[#allocation5 + $0x60] ss:$16 sps:$4 sm:$0xff]   ;;  %v240_v53 = vrot.slane %v79_v52, %v3029_v49  ;;  %v2625_v43 = vld [vmem:[#allocation5 + $0x2c] ss:$16 sps:$4 sm:$0xff]  }
  0x3c   :  { %v2517_v17 = vld [vmem:[#allocation5 + $0x264] ss:$16 sps:$4 sm:$0xff]   ;;  %v2520_v19 = vld [vmem:[#allocation5 + $0x260] ss:$16 sps:$4 sm:$0xff]   ;;  %vm2210_vm11 = vcmask 1024  }
  0x3d   :  { %948 = vmatpush1.bf16.msra.mxu0 %v2507_v10  ;;  %v2521_v20 = vld [vmem:[#allocation5 + $0x44] ss:$16 sps:$4 sm:$0xff]   ;;  %v2525_v22 = vld [vmem:[#allocation5 + $0x40] ss:$16 sps:$4 sm:$0xff]   ;;  %v248_v58 = vcombine.high %v240_v53, %v240_v53  ;;  %v3037_v10 = vrot.slane %v240_v53, %v3029_v49  ;;  %v2635_v53 = vld [vmem:[#allocation5 + $0x1e8] ss:$16 sps:$4 sm:$0xff]  }
  0x3e   :  { %989 = vmatpush1.bf16.msra.mxu1 %v2508_v11  ;;  %949 = vmatprep.subr.bf16.mxu0 %v2509_v12  ;;  %v2523_v21 = vld [vmem:[#allocation5 + $0x244] ss:$16 sps:$4 sm:$0xff]   ;;  %v2526_v23 = vld [vmem:[#allocation5 + $0x240] ss:$16 sps:$4 sm:$0xff]  }
  0x3f   :  { %990 = vmatprep.subr.bf16.mxu1 %v2511_v13  ;;  %v2527_v24 = vld [vmem:[#allocation5 + $0x24] ss:$16 sps:$4 sm:$0xff]   ;;  %v2531_v26 = vld [vmem:[#allocation5 + $0x20] ss:$16 sps:$4 sm:$0xff]   ;;  %v269_v59 = vrot.slane %v248_v58, %v3029_v49  ;;  %v2646_v58 = vld [vmem:[#allocation5 + $0x3ec] ss:$16 sps:$4 sm:$0xff]  }
  0x40   :  { %v2529_v25 = vld [vmem:[#allocation5 + $0x224] ss:$16 sps:$4 sm:$0xff]   ;;  %v2532_v27 = vld [vmem:[#allocation5 + $0x220] ss:$16 sps:$4 sm:$0xff]  }
  0x41   :  { %950 = vmatpush1.bf16.msra.mxu0 %v2513_v14  ;;  %v2533_v28 = vld [vmem:[#allocation5 + $0x4] ss:$16 sps:$4 sm:$0xff]   ;;  %v2537_v30 = vld [vmem:[#allocation5] ss:$16 sps:$4 sm:$0xff]   ;;  %v3033_v0 = vcombine.high %v269_v59, %v269_v59  ;;  %975 = vmatprep.mubr.bf16.mxu0 %v269_v59  ;;  %v2591_v14 = vld [vmem:[#allocation5 + $0xec] ss:$16 sps:$4 sm:$0xff]  }
  0x42   :  { %991 = vmatpush1.bf16.msra.mxu1 %v2514_v15  ;;  %951 = vmatprep.subr.bf16.mxu0 %v2515_v16  ;;  %v2535_v29 = vld [vmem:[#allocation5 + $0x204] ss:$16 sps:$4 sm:$0xff]   ;;  %v2538_v31 = vld [vmem:[#allocation5 + $0x200] ss:$16 sps:$4 sm:$0xff]   ;;  %v233_v16 = vcombine.high %v79_v52, %v79_v52  ;;  %v2632_v52 = vld [vmem:[#allocation5 + $0x228] ss:$16 sps:$4 sm:$0xff]  }
  0x43   :  { %992 = vmatprep.subr.bf16.mxu1 %v2517_v17  ;;  %v2539_v32 = vld [vmem:[#allocation5 + $0x1e4] ss:$16 sps:$4 sm:$0xff]   ;;  %v2543_v34 = vld [vmem:[#allocation5 + $0x1e0] ss:$16 sps:$4 sm:$0xff]   ;;  %1016 = vmatprep.mubr.bf16.mxu1 %v3033_v0  ;;  %v3041_v17 = vcombine.high %v3037_v10, %v3037_v10 }
  0x44   :  { %v2541_v33 = vld [vmem:[#allocation5 + $0x3e4] ss:$16 sps:$4 sm:$0xff]   ;;  %v2544_v35 = vld [vmem:[#allocation5 + $0x3e0] ss:$16 sps:$4 sm:$0xff]  }
  0x45   :  { %952 = vmatpush1.bf16.msra.mxu0 %v2519_v18  ;;  %v2545_v39 = vld [vmem:[#allocation5 + $0x1c4] ss:$16 sps:$4 sm:$0xff]   ;;  %v2549_v41 = vld [vmem:[#allocation5 + $0x1c0] ss:$16 sps:$4 sm:$0xff]   ;;  %v2589_v18 = vld [vmem:[#allocation5 + $0xe8] ss:$16 sps:$4 sm:$0xff]  }
  0x46   :  { %993 = vmatpush1.bf16.msra.mxu1 %v2520_v19  ;;  %953 = vmatprep.subr.bf16.mxu0 %v2521_v20  ;;  %v2547_v40 = vld [vmem:[#allocation5 + $0x3c4] ss:$16 sps:$4 sm:$0xff]   ;;  %v2550_v44 = vld [vmem:[#allocation5 + $0x3c0] ss:$16 sps:$4 sm:$0xff]   ;;  %v2595_v20 = vld [vmem:[#allocation5 + $0xcc] ss:$16 sps:$4 sm:$0xff]  }
  0x47   :  { %994 = vmatprep.subr.bf16.mxu1 %v2523_v21  ;;  %v2551_v45 = vld [vmem:[#allocation5 + $0x1a4] ss:$16 sps:$4 sm:$0xff]   ;;  %v2555_v47 = vld [vmem:[#allocation5 + $0x1a0] ss:$16 sps:$4 sm:$0xff]   ;;  %v2598_v21 = vld [vmem:[#allocation5 + $0x2ec] ss:$16 sps:$4 sm:$0xff]  }
  0x48   :  { %v2553_v46 = vld [vmem:[#allocation5 + $0x3a4] ss:$16 sps:$4 sm:$0xff]   ;;  %v2556_v48 = vld [vmem:[#allocation5 + $0x3a0] ss:$16 sps:$4 sm:$0xff]  }
  0x49   :  { %954 = vmatpush1.bf16.msra.mxu0 %v2525_v22  ;;  %v2557_v50 = vld [vmem:[#allocation5 + $0x184] ss:$16 sps:$4 sm:$0xff]   ;;  %v2561_v54 = vld [vmem:[#allocation5 + $0x180] ss:$16 sps:$4 sm:$0xff]   ;;  %v247_v22 = vrot.slane %v233_v16, %v3029_v49  ;;  %v2679_v16 = vld [vmem:[#allocation5 + $0x10c] ss:$16 sps:$4 sm:$0xff]  }
  0x4a   :  { %995 = vmatpush1.bf16.msra.mxu1 %v2526_v23  ;;  %955 = vmatprep.subr.bf16.mxu0 %v2527_v24  ;;  %v2559_v51 = vld [vmem:[#allocation5 + $0x384] ss:$16 sps:$4 sm:$0xff]   ;;  %v2562_v55 = vld [vmem:[#allocation5 + $0x380] ss:$16 sps:$4 sm:$0xff]   ;;  %v2593_v23 = vld [vmem:[#allocation5 + $0xc8] ss:$16 sps:$4 sm:$0xff]  }
  0x4b   :  { %996 = vmatprep.subr.bf16.mxu1 %v2529_v25  ;;  %v2563_v56 = vld [vmem:[#allocation5 + $0x164] ss:$16 sps:$4 sm:$0xff]   ;;  %v2567_v60 = vld [vmem:[#allocation5 + $0x160] ss:$16 sps:$4 sm:$0xff]   ;;  %v2973_v24 = vmov 0  }
  0x4c   :  { %v2565_v57 = vld [vmem:[#allocation5 + $0x364] ss:$16 sps:$4 sm:$0xff]   ;;  %v2568_v61 = vld [vmem:[#allocation5 + $0x360] ss:$16 sps:$4 sm:$0xff]   ;;  %v2601_v25 = vld [vmem:[#allocation5 + $0xac] ss:$16 sps:$4 sm:$0xff]  }
  0x4d   :  { %956 = vmatpush1.bf16.msra.mxu0 %v2531_v26  ;;  %v2569_v62 = vld [vmem:[#allocation5 + $0x144] ss:$16 sps:$4 sm:$0xff]   ;;  %v2573_v1 = vld [vmem:[#allocation5 + $0x140] ss:$16 sps:$4 sm:$0xff]   ;;  %v3050_v26 = vrot.slane %v247_v22, %v3029_v49  ;;  %v2629_v49 = vld [vmem:[#allocation5 + $0x8] ss:$16 sps:$4 sm:$0xff]  }
  0x4e   :  { %997 = vmatpush1.bf16.msra.mxu1 %v2532_v27  ;;  %957 = vmatprep.subr.bf16.mxu0 %v2533_v28  ;;  %v2571_v63 = vld [vmem:[#allocation5 + $0x344] ss:$16 sps:$4 sm:$0xff]   ;;  %v2574_v2 = vld [vmem:[#allocation5 + $0x340] ss:$16 sps:$4 sm:$0xff]   ;;  %v2596_v27 = vld [vmem:[#allocation5 + $0x2e8] ss:$16 sps:$4 sm:$0xff]  }
  0x4f   :  { %998 = vmatprep.subr.bf16.mxu1 %v2535_v29  ;;  %v2575_v3 = vld [vmem:[#allocation5 + $0x124] ss:$16 sps:$4 sm:$0xff]   ;;  %v2579_v5 = vld [vmem:[#allocation5 + $0x120] ss:$16 sps:$4 sm:$0xff]   ;;  %v2599_v28 = vld [vmem:[#allocation5 + $0xa8] ss:$16 sps:$4 sm:$0xff]  }
  0x50   :  { %v2577_v4 = vld [vmem:[#allocation5 + $0x324] ss:$16 sps:$4 sm:$0xff]   ;;  %v2580_v6 = vld [vmem:[#allocation5 + $0x320] ss:$16 sps:$4 sm:$0xff]   ;;  %v2604_v29 = vld [vmem:[#allocation5 + $0x2cc] ss:$16 sps:$4 sm:$0xff]  }
  0x51   :  { %958 = vmatpush1.bf16.msra.mxu0 %v2537_v30  ;;  %v2581_v7 = vld [vmem:[#allocation5 + $0x104] ss:$16 sps:$4 sm:$0xff]   ;;  %v2585_v11 = vld [vmem:[#allocation5 + $0x100] ss:$16 sps:$4 sm:$0xff]   ;;  %v2607_v30 = vld [vmem:[#allocation5 + $0x8c] ss:$16 sps:$4 sm:$0xff]  }
  0x52   :  { %999 = vmatpush1.bf16.msra.mxu1 %v2538_v31  ;;  %959 = vmatprep.subr.bf16.mxu0 %v2539_v32  ;;  %v2583_v8 = vld [vmem:[#allocation5 + $0x304] ss:$16 sps:$4 sm:$0xff]   ;;  %v2586_v12 = vld [vmem:[#allocation5 + $0x300] ss:$16 sps:$4 sm:$0xff]   ;;  %v2602_v31 = vld [vmem:[#allocation5 + $0x2c8] ss:$16 sps:$4 sm:$0xff]  }
  0x53   :  { %1000 = vmatprep.subr.bf16.mxu1 %v2541_v33  ;;  %v208_v9 = vld [vmem:[#allocation5 + $0x400] sm:$0x11]  ;;  %v2605_v32 = vld [vmem:[#allocation5 + $0x88] ss:$16 sps:$4 sm:$0xff]   ;;  %v2610_v33 = vld [vmem:[#allocation5 + $0x2ac] ss:$16 sps:$4 sm:$0xff]  }
  0x54   :  { %v2348_v13 = vcombine.high %v208_v9, %v208_v9  ;;  %v2347_v15 = vcombine.low %v208_v9, %v208_v9  ;;  %v2665_v9 = vld [vmem:[#allocation5 + $0x148] ss:$16 sps:$4 sm:$0xff]  }
  0x55   :  { %960 = vmatpush2.bf16.msra.mxu0 %v2543_v34  ;;  %v2613_v34 = vld [vmem:[#allocation5 + $0x6c] ss:$16 sps:$4 sm:$0xff]  }
  0x56   :  { %1001 = vmatpush2.bf16.msra.mxu1 %v2544_v35  ;;  %961 = vmatprep.subr.bf16.mxu0 %v2545_v39  ;;  %v932_v19 = vsel %vm930_vm0, %v2347_v15, 0  ;;  %v2608_v35 = vld [vmem:[#allocation5 + $0x2a8] ss:$16 sps:$4 sm:$0xff]   ;;  %v2676_v15 = vld [vmem:[#allocation5 + $0x34c] ss:$16 sps:$4 sm:$0xff]  }
  0x57   :  { %1002 = vmatprep.subr.bf16.mxu1 %v2547_v40  ;;  %v2614_v39 = vld [vmem:[#allocation5 + $0x288] ss:$16 sps:$4 sm:$0xff]  }
  0x58   :  { %v2617_v40 = vld [vmem:[#allocation5 + $0x48] ss:$16 sps:$4 sm:$0xff]  }
  0x59   :  { %962 = vmatpush2.bf16.msra.mxu0 %v2549_v41  ;;  %v2622_v41 = vld [vmem:[#allocation5 + $0x26c] ss:$16 sps:$4 sm:$0xff]  }
  0x5a   :  { %1003 = vmatpush2.bf16.msra.mxu1 %v2550_v44  ;;  %963 = vmatprep.subr.bf16.mxu0 %v2551_v45  ;;  %v2620_v44 = vld [vmem:[#allocation5 + $0x268] ss:$16 sps:$4 sm:$0xff]  }
  0x5b   :  { %1004 = vmatprep.subr.bf16.mxu1 %v2553_v46  ;;  %v2623_v45 = vld [vmem:[#allocation5 + $0x28] ss:$16 sps:$4 sm:$0xff]   ;;  %v2628_v46 = vld [vmem:[#allocation5 + $0x24c] ss:$16 sps:$4 sm:$0xff]  }
  0x5d   :  { %964 = vmatpush2.bf16.msra.mxu0 %v2555_v47  ;;  %v2631_v47 = vld [vmem:[#allocation5 + $0xc] ss:$16 sps:$4 sm:$0xff]  }
  0x5e   :  { %1005 = vmatpush2.bf16.msra.mxu1 %v2556_v48  ;;  %965 = vmatprep.subr.bf16.mxu0 %v2557_v50  ;;  %v2626_v48 = vld [vmem:[#allocation5 + $0x248] ss:$16 sps:$4 sm:$0xff]   ;;  %v2634_v50 = vld [vmem:[#allocation5 + $0x22c] ss:$16 sps:$4 sm:$0xff]  }
  0x5f   :  { %1006 = vmatprep.subr.bf16.mxu1 %v2559_v51  ;;  %v2637_v51 = vld [vmem:[#allocation5 + $0x1ec] ss:$16 sps:$4 sm:$0xff]  }
  0x61   :  { %966 = vmatpush2.bf16.msra.mxu0 %v2561_v54  ;;  %v2640_v54 = vld [vmem:[#allocation5 + $0x20c] ss:$16 sps:$4 sm:$0xff]  }
  0x62   :  { %1007 = vmatpush2.bf16.msra.mxu1 %v2562_v55  ;;  %967 = vmatprep.subr.bf16.mxu0 %v2563_v56  ;;  %v2643_v55 = vld [vmem:[#allocation5 + $0x1cc] ss:$16 sps:$4 sm:$0xff]   ;;  %v2638_v56 = vld [vmem:[#allocation5 + $0x208] ss:$16 sps:$4 sm:$0xff]  }
  0x63   :  { %1008 = vmatprep.subr.bf16.mxu1 %v2565_v57  ;;  %v2641_v57 = vld [vmem:[#allocation5 + $0x1c8] ss:$16 sps:$4 sm:$0xff]  }
  0x65   :  { %968 = vmatpush2.bf16.msra.mxu0 %v2567_v60  ;;  %v2644_v60 = vld [vmem:[#allocation5 + $0x3e8] ss:$16 sps:$4 sm:$0xff]  }
  0x66   :  { %1009 = vmatpush2.bf16.msra.mxu1 %v2568_v61  ;;  %969 = vmatprep.subr.bf16.mxu0 %v2569_v62  ;;  %v2647_v61 = vld [vmem:[#allocation5 + $0x1a8] ss:$16 sps:$4 sm:$0xff]   ;;  %v2652_v62 = vld [vmem:[#allocation5 + $0x3cc] ss:$16 sps:$4 sm:$0xff]  }
  0x67   :  { %1010 = vmatprep.subr.bf16.mxu1 %v2571_v63  ;;  %v2655_v63 = vld [vmem:[#allocation5 + $0x18c] ss:$16 sps:$4 sm:$0xff]  }
  0x69   :  { %970 = vmatpush2.bf16.msra.mxu0 %v2573_v1  ;;  %v2653_v1 = vld [vmem:[#allocation5 + $0x188] ss:$16 sps:$4 sm:$0xff]  }
  0x6a   :  { %1011 = vmatpush2.bf16.msra.mxu1 %v2574_v2  ;;  %971 = vmatprep.subr.bf16.mxu0 %v2575_v3  ;;  %v2658_v2 = vld [vmem:[#allocation5 + $0x3ac] ss:$16 sps:$4 sm:$0xff]  }
  0x6b   :  { %1012 = vmatprep.subr.bf16.mxu1 %v2577_v4  ;;  %v2661_v3 = vld [vmem:[#allocation5 + $0x16c] ss:$16 sps:$4 sm:$0xff]   ;;  %v2656_v4 = vld [vmem:[#allocation5 + $0x3a8] ss:$16 sps:$4 sm:$0xff]  }
  0x6d   :  { %972 = vmatpush2.bf16.msra.mxu0 %v2579_v5  ;;  %v2659_v5 = vld [vmem:[#allocation5 + $0x168] ss:$16 sps:$4 sm:$0xff]  }
  0x6e   :  { %1013 = vmatpush2.bf16.msra.mxu1 %v2580_v6  ;;  %973 = vmatprep.subr.bf16.mxu0 %v2581_v7  ;;  %v2664_v6 = vld [vmem:[#allocation5 + $0x38c] ss:$16 sps:$4 sm:$0xff]  }
  0x6f   :  { %1014 = vmatprep.subr.bf16.mxu1 %v2583_v8  ;;  %v2667_v7 = vld [vmem:[#allocation5 + $0x14c] ss:$16 sps:$4 sm:$0xff]   ;;  %v2662_v8 = vld [vmem:[#allocation5 + $0x388] ss:$16 sps:$4 sm:$0xff]  }
  0x71   :  { %974 = vmatpush2.bf16.msra.mxu0 %v2585_v11  ;;  %v2670_v11 = vld [vmem:[#allocation5 + $0x36c] ss:$16 sps:$4 sm:$0xff]  }
  0x72   :  { %1015 = vmatpush2.bf16.msra.mxu1 %v2586_v12  ;;  %2351 = vmatprep.subr.msk.bf16.mxu0 %vm930_vm0, %v2348_v13  ;;  %v2673_v12 = vld [vmem:[#allocation5 + $0x12c] ss:$16 sps:$4 sm:$0xff]   ;;  %v2668_v13 = vld [vmem:[#allocation5 + $0x368] ss:$16 sps:$4 sm:$0xff]  }
  0x73   :  { %1066 = vmatprep.subr.bf16.mxu1 %v2591_v14  ;;  %v2671_v14 = vld [vmem:[#allocation5 + $0x128] ss:$16 sps:$4 sm:$0xff]  }
  0x74   :  { %976 = vmatmul.mubr.bf16.vlgmr.msra.gmra.mxu0 %v3037_v10 }
  0x75   :  { %1017 = vmatmul.mubr.bf16.vlgmr.msra.gmra.mxu1 %v3041_v17  ;;  %1040 = vmatpush1.bf16.msra.mxu0 %v932_v19  ;;  %v2674_v19 = vld [vmem:[#allocation5 + $0x348] ss:$16 sps:$4 sm:$0xff]  }
  0x76   :  { %1067 = vmatpush1.bf16.msra.mxu1 %v2589_v18  ;;  %1057 = vmatprep.mubr.bf16.mxu0 %v2973_v24  ;;  %v209_v18 = vld [vmem:[#allocation5 + $0x408] sm:$0x11] }
  0x77   :  { %1068 = vmatprep.subr.bf16.mxu1 %v2595_v20  ;;  %1107 = vmatprep.subr.bf16.mxu0 %v2598_v21  ;;  %v2677_v20 = vld [vmem:[#allocation5 + $0x108] ss:$16 sps:$4 sm:$0xff]   ;;  %v2682_v21 = vld [vmem:[#allocation5 + $0x32c] ss:$16 sps:$4 sm:$0xff]   ;;  %v2350_v22 = vcombine.high %v209_v18, %v209_v18 }
  0x78   :  { %1098 = vmatprep.mubr.bf16.mxu1 %v269_v59  ;;  %v2649_v59 = vld [vmem:[#allocation5 + $0x1ac] ss:$16 sps:$4 sm:$0xff]  }
  0x7a   :  { %1069 = vmatpush1.bf16.msra.mxu1 %v2593_v23  ;;  %v2349_v23 = vcombine.low %v209_v18, %v209_v18  ;;  %v2807_v18 = vld [vmem:[#allocation7 + $0x384] ss:$16 sps:$4 sm:$0xff]  }
  0x7b   :  { %1070 = vmatprep.subr.bf16.mxu1 %v2601_v25  ;;  %v2680_v25 = vld [vmem:[#allocation5 + $0x328] ss:$16 sps:$4 sm:$0xff]  }
  0x7c   :  { %2352 = vmatmul.mubr.msk.bf16.vlgmr.msra.gmra.mxu0 %vm926_vm1, %v3050_v26 }
  0x7d   :  { %1108 = vmatpush1.bf16.msra.mxu0 %v2596_v27  ;;  %1139 = vmatprep.mubr.bf16.mxu0 %v3033_v0  ;;  %v2650_v0 = vld [vmem:[#allocation5 + $0x3c8] ss:$16 sps:$4 sm:$0xff]   ;;  %v2687_v27 = vld [vmem:[#allocation5 + $0x30c] ss:$16 sps:$4 sm:$0xff]  }
  0x7e   :  { %1071 = vmatpush1.bf16.msra.mxu1 %v2599_v28  ;;  %1109 = vmatprep.subr.bf16.mxu0 %v2604_v29  ;;  %v938_v28 = vsel %vm930_vm0, %v2349_v23, 0  ;;  %v2685_v29 = vld [vmem:[#allocation5 + $0x308] ss:$16 sps:$4 sm:$0xff]   ;;  %v2811_v23 = vld [vmem:[#allocation7 + $0x360] ss:$16 sps:$4 sm:$0xff]  }
  0x7f   :  { %1072 = vmatprep.subr.bf16.mxu1 %v2607_v30  ;;  %v2690_v30 = vld [vmem:[#allocation7 + $0xe4] ss:$16 sps:$4 sm:$0xff]  }
  0x81   :  { %1110 = vmatpush1.bf16.msra.mxu0 %v2602_v31  ;;  %v2688_v31 = vld [vmem:[#allocation7 + $0xe0] ss:$16 sps:$4 sm:$0xff]  }
  0x82   :  { %1073 = vmatpush1.bf16.msra.mxu1 %v2605_v32  ;;  %1111 = vmatprep.subr.bf16.mxu0 %v2610_v33  ;;  %v2693_v32 = vld [vmem:[#allocation7 + $0xc4] ss:$16 sps:$4 sm:$0xff]   ;;  %v2691_v33 = vld [vmem:[#allocation7 + $0xc0] ss:$16 sps:$4 sm:$0xff]  }
  0x83   :  { %1074 = vmatprep.subr.bf16.mxu1 %v2613_v34  ;;  %v2694_v34 = vld [vmem:[#allocation7 + $0xa0] ss:$16 sps:$4 sm:$0xff]  }
  0x85   :  { %1112 = vmatpush1.bf16.msra.mxu0 %v2608_v35  ;;  %v2699_v35 = vld [vmem:[#allocation7 + $0x84] ss:$16 sps:$4 sm:$0xff]  }
  0x86   :  { %1075 = vmatpush1.bf16.msra.mxu1 %v2611_v36  ;;  %1113 = vmatprep.subr.bf16.mxu0 %v2616_v37  ;;  %v2702_v36 = vld [vmem:[#allocation7 + $0x64] ss:$16 sps:$4 sm:$0xff]  }
  0x87   :  { %1076 = vmatprep.subr.bf16.mxu1 %v2619_v38  ;;  %v2741_v37 = vld [vmem:[#allocation7 + $0x2e4] ss:$16 sps:$4 sm:$0xff]   ;;  %v2739_v38 = vld [vmem:[#allocation7 + $0x2e0] ss:$16 sps:$4 sm:$0xff]  }
  0x89   :  { %1114 = vmatpush1.bf16.msra.mxu0 %v2614_v39  ;;  %v2745_v39 = vld [vmem:[#allocation7 + $0x2c0] ss:$16 sps:$4 sm:$0xff]  }
  0x8a   :  { %1077 = vmatpush1.bf16.msra.mxu1 %v2617_v40  ;;  %1115 = vmatprep.subr.bf16.mxu0 %v2622_v41  ;;  %v2705_v40 = vld [vmem:[#allocation7 + $0x44] ss:$16 sps:$4 sm:$0xff]   ;;  %v2703_v41 = vld [vmem:[#allocation7 + $0x40] ss:$16 sps:$4 sm:$0xff]  }
  0x8b   :  { %1078 = vmatprep.subr.bf16.mxu1 %v2625_v43  ;;  %v2751_v43 = vld [vmem:[#allocation7 + $0x2a0] ss:$16 sps:$4 sm:$0xff]  }
  0x8d   :  { %1116 = vmatpush1.bf16.msra.mxu0 %v2620_v44  ;;  %v2753_v44 = vld [vmem:[#allocation7 + $0x2a4] ss:$16 sps:$4 sm:$0xff]  }
  0x8e   :  { %1079 = vmatpush1.bf16.msra.mxu1 %v2623_v45  ;;  %1117 = vmatprep.subr.bf16.mxu0 %v2628_v46  ;;  %v2708_v45 = vld [vmem:[#allocation7 + $0x24] ss:$16 sps:$4 sm:$0xff]   ;;  %v2706_v46 = vld [vmem:[#allocation7 + $0x20] ss:$16 sps:$4 sm:$0xff]  }
  0x8f   :  { %1080 = vmatprep.subr.bf16.mxu1 %v2631_v47  ;;  %v2757_v47 = vld [vmem:[#allocation7 + $0x280] ss:$16 sps:$4 sm:$0xff]  }
  0x91   :  { %1118 = vmatpush1.bf16.msra.mxu0 %v2626_v48  ;;  %v2759_v48 = vld [vmem:[#allocation7 + $0x284] ss:$16 sps:$4 sm:$0xff]  }
  0x92   :  { %1081 = vmatpush1.bf16.msra.mxu1 %v2629_v49  ;;  %1119 = vmatprep.subr.bf16.mxu0 %v2634_v50  ;;  %v2711_v49 = vld [vmem:[#allocation7 + $0x4] ss:$16 sps:$4 sm:$0xff]   ;;  %v2709_v50 = vld [vmem:[#allocation7] ss:$16 sps:$4 sm:$0xff]  }
  0x93   :  { %1082 = vmatprep.subr.bf16.mxu1 %v2637_v51  ;;  %v2763_v51 = vld [vmem:[#allocation7 + $0x260] ss:$16 sps:$4 sm:$0xff]  }
  0x95   :  { %1120 = vmatpush1.bf16.msra.mxu0 %v2632_v52  ;;  %v2765_v52 = vld [vmem:[#allocation7 + $0x264] ss:$16 sps:$4 sm:$0xff]  }
  0x96   :  { %1083 = vmatpush2.bf16.msra.mxu1 %v2635_v53  ;;  %1121 = vmatprep.subr.bf16.mxu0 %v2640_v54  ;;  %v2714_v53 = vld [vmem:[#allocation7 + $0x1e4] ss:$16 sps:$4 sm:$0xff]   ;;  %v2712_v54 = vld [vmem:[#allocation7 + $0x1e0] ss:$16 sps:$4 sm:$0xff]  }
  0x97   :  { %1084 = vmatprep.subr.bf16.mxu1 %v2643_v55  ;;  %v2769_v55 = vld [vmem:[#allocation7 + $0x240] ss:$16 sps:$4 sm:$0xff]  }
  0x99   :  { %1122 = vmatpush1.bf16.msra.mxu0 %v2638_v56  ;;  %v2771_v56 = vld [vmem:[#allocation7 + $0x244] ss:$16 sps:$4 sm:$0xff]  }
  0x9a   :  { %1085 = vmatpush2.bf16.msra.mxu1 %v2641_v57  ;;  %1123 = vmatprep.subr.bf16.mxu0 %v2646_v58  ;;  %v2717_v57 = vld [vmem:[#allocation7 + $0x1c4] ss:$16 sps:$4 sm:$0xff]   ;;  %v2715_v58 = vld [vmem:[#allocation7 + $0x1c0] ss:$16 sps:$4 sm:$0xff]  }
  0x9b   :  { %1086 = vmatprep.subr.bf16.mxu1 %v2649_v59  ;;  %v2775_v59 = vld [vmem:[#allocation7 + $0x220] ss:$16 sps:$4 sm:$0xff]  }
  0x9d   :  { %1124 = vmatpush2.bf16.msra.mxu0 %v2644_v60  ;;  %v2777_v60 = vld [vmem:[#allocation7 + $0x224] ss:$16 sps:$4 sm:$0xff]  }
  0x9e   :  { %1087 = vmatpush2.bf16.msra.mxu1 %v2647_v61  ;;  %1125 = vmatprep.subr.bf16.mxu0 %v2652_v62  ;;  %v2720_v61 = vld [vmem:[#allocation7 + $0x1a4] ss:$16 sps:$4 sm:$0xff]   ;;  %v2718_v62 = vld [vmem:[#allocation7 + $0x1a0] ss:$16 sps:$4 sm:$0xff]  }
  0x9f   :  { %1088 = vmatprep.subr.bf16.mxu1 %v2655_v63  ;;  %v2781_v63 = vld [vmem:[#allocation7 + $0x200] ss:$16 sps:$4 sm:$0xff]  }
  0xa1   :  { %1126 = vmatpush2.bf16.msra.mxu0 %v2650_v0  ;;  %v2783_v0 = vld [vmem:[#allocation7 + $0x204] ss:$16 sps:$4 sm:$0xff]  }
  0xa2   :  { %1089 = vmatpush2.bf16.msra.mxu1 %v2653_v1  ;;  %1127 = vmatprep.subr.bf16.mxu0 %v2658_v2  ;;  %v2723_v1 = vld [vmem:[#allocation7 + $0x184] ss:$16 sps:$4 sm:$0xff]   ;;  %v2721_v2 = vld [vmem:[#allocation7 + $0x180] ss:$16 sps:$4 sm:$0xff]  }
  0xa3   :  { %1090 = vmatprep.subr.bf16.mxu1 %v2661_v3  ;;  %v2787_v3 = vld [vmem:[#allocation7 + $0x3e0] ss:$16 sps:$4 sm:$0xff]  }
  0xa5   :  { %1128 = vmatpush2.bf16.msra.mxu0 %v2656_v4  ;;  %v2789_v4 = vld [vmem:[#allocation7 + $0x3e4] ss:$16 sps:$4 sm:$0xff]  }
  0xa6   :  { %1091 = vmatpush2.bf16.msra.mxu1 %v2659_v5  ;;  %1129 = vmatprep.subr.bf16.mxu0 %v2664_v6  ;;  %v2726_v5 = vld [vmem:[#allocation7 + $0x164] ss:$16 sps:$4 sm:$0xff]   ;;  %v2724_v6 = vld [vmem:[#allocation7 + $0x160] ss:$16 sps:$4 sm:$0xff]  }
  0xa7   :  { %1092 = vmatprep.subr.bf16.mxu1 %v2667_v7  ;;  %v2793_v7 = vld [vmem:[#allocation7 + $0x3c0] ss:$16 sps:$4 sm:$0xff]  }
  0xa9   :  { %1130 = vmatpush2.bf16.msra.mxu0 %v2662_v8  ;;  %v2795_v8 = vld [vmem:[#allocation7 + $0x3c4] ss:$16 sps:$4 sm:$0xff]  }
  0xaa   :  { %1093 = vmatpush2.bf16.msra.mxu1 %v2665_v9  ;;  %1131 = vmatprep.subr.bf16.mxu0 %v2670_v11  ;;  %v2729_v9 = vld [vmem:[#allocation7 + $0x144] ss:$16 sps:$4 sm:$0xff]   ;;  %v2727_v11 = vld [vmem:[#allocation7 + $0x140] ss:$16 sps:$4 sm:$0xff]  }
  0xab   :  { %1094 = vmatprep.subr.bf16.mxu1 %v2673_v12  ;;  %v2799_v12 = vld [vmem:[#allocation7 + $0x3a0] ss:$16 sps:$4 sm:$0xff]  }
  0xad   :  { %1132 = vmatpush2.bf16.msra.mxu0 %v2668_v13  ;;  %v2801_v13 = vld [vmem:[#allocation7 + $0x3a4] ss:$16 sps:$4 sm:$0xff]  }
  0xae   :  { %1095 = vmatpush2.bf16.msra.mxu1 %v2671_v14  ;;  %1133 = vmatprep.subr.bf16.mxu0 %v2676_v15  ;;  %v2732_v14 = vld [vmem:[#allocation7 + $0x124] ss:$16 sps:$4 sm:$0xff]   ;;  %v2730_v15 = vld [vmem:[#allocation7 + $0x120] ss:$16 sps:$4 sm:$0xff]  }
  0xaf   :  { %1096 = vmatprep.subr.bf16.mxu1 %v2679_v16  ;;  %v2805_v16 = vld [vmem:[#allocation7 + $0x380] ss:$16 sps:$4 sm:$0xff]  }
  0xb1   :  { %1134 = vmatpush2.bf16.msra.mxu0 %v2674_v19  ;;  %v2735_v19 = vld [vmem:[#allocation7 + $0x104] ss:$16 sps:$4 sm:$0xff]  }
  0xb2   :  { %1097 = vmatpush2.bf16.msra.mxu1 %v2677_v20  ;;  %1135 = vmatprep.subr.bf16.mxu0 %v2682_v21  ;;  %v2733_v20 = vld [vmem:[#allocation7 + $0x100] ss:$16 sps:$4 sm:$0xff]   ;;  %v2738_v21 = vld [vmem:[#allocation7 + $0xec] ss:$16 sps:$4 sm:$0xff]  }
  0xb3   :  { %2353 = vmatprep.subr.msk.bf16.mxu1 %vm930_vm0, %v2350_v22  ;;  %v2813_v22 = vld [vmem:[#allocation7 + $0x364] ss:$16 sps:$4 sm:$0xff]  }
  0xb5   :  { %1099 = vmatmul.mubr.bf16.vlgmr.msra.gmra.mxu1 %v3037_v10  ;;  %1136 = vmatpush2.bf16.msra.mxu0 %v2680_v25  ;;  %v2696_v10 = vld [vmem:[#allocation7 + $0xa4] ss:$16 sps:$4 sm:$0xff]  }
  0xb6   :  { %1163 = vmatpush1.bf16.msra.mxu1 %v938_v28  ;;  %1137 = vmatprep.subr.bf16.mxu0 %v2687_v27  ;;  %v2819_v25 = vld [vmem:[#allocation7 + $0x344] ss:$16 sps:$4 sm:$0xff]   ;;  %v2817_v27 = vld [vmem:[#allocation7 + $0x340] ss:$16 sps:$4 sm:$0xff]  }
  0xb7   :  { %1180 = vmatprep.mubr.bf16.mxu1 %v2973_v24  ;;  %v2697_v24 = vld [vmem:[#allocation7 + $0x80] ss:$16 sps:$4 sm:$0xff]   ;;  %2036 = vmatprep.subr.bf16.mxu1 %v2741_v37  ;;  %v2825_v28 = vld [vmem:[#allocation7 + $0x324] ss:$16 sps:$4 sm:$0xff]  }
  0xb9   :  { %1138 = vmatpush2.bf16.msra.mxu0 %v2685_v29  ;;  %v2823_v29 = vld [vmem:[#allocation7 + $0x320] ss:$16 sps:$4 sm:$0xff]  }
  0xba   :  { %1995 = vmatprep.subr.bf16.mxu0 %v2690_v30  ;;  %v2831_v30 = vld [vmem:[#allocation7 + $0x304] ss:$16 sps:$4 sm:$0xff]  }
  0xbc   :  { %1140 = vmatmul.mubr.bf16.vlgmr.msra.gmra.mxu0 %v3041_v17  ;;  %v2700_v17 = vld [vmem:[#allocation7 + $0x60] ss:$16 sps:$4 sm:$0xff]  }
  0xbd   :  { %2354 = vmatmul.mubr.msk.bf16.vlgmr.msra.gmra.mxu1 %vm926_vm1, %v3050_v26  ;;  %1996 = vmatpush1.bf16.msra.mxu0 %v2688_v31  ;;  %v2747_v26 = vld [vmem:[#allocation7 + $0x2c4] ss:$16 sps:$4 sm:$0xff]   ;;  %v2829_v31 = vld [vmem:[#allocation7 + $0x300] ss:$16 sps:$4 sm:$0xff]  }
  0xbe   :  { %1997 = vmatprep.subr.bf16.mxu0 %v2693_v32  ;;  %2037 = vmatpush1.bf16.msra.mxu1 %v2739_v38  ;;  %v2834_v32 = vld [vmem:[#allocation7 + $0x2ec] ss:$16 sps:$4 sm:$0xff]  }
  0xbf   :  { %2038 = vmatprep.subr.bf16.mxu1 %v2747_v26 }
  0xc1   :  { %1998 = vmatpush1.bf16.msra.mxu0 %v2691_v33  ;;  %v3063_v33 = vsub.s32 0, %v3026_v42 }
  0xc2   :  { %1999 = vmatprep.subr.bf16.mxu0 %v2696_v10  ;;  %2039 = vmatpush1.bf16.msra.mxu1 %v2745_v39  ;;  %v3068_v10 = vld [vmem:[%s3118_s2] sm:$0xf] }
  0xc3   :  { %2040 = vmatprep.subr.bf16.mxu1 %v2753_v44 }
  0xc5   :  { %2000 = vmatpush1.bf16.msra.mxu0 %v2694_v34  ;;  %v3071_v34 = vsub.s32 1, %v3026_v42 }
  0xc6   :  { %2001 = vmatprep.subr.bf16.mxu0 %v2699_v35  ;;  %2041 = vmatpush1.bf16.msra.mxu1 %v2751_v43  ;;  %v215_v35 = vrot.slane %v3068_v10, %v3063_v33 }
  0xc7   :  { %2042 = vmatprep.subr.bf16.mxu1 %v2759_v48  ;;  %v219_v37 = vrot.slane %v3068_v10, %v3071_v34 }
  0xc9   :  { %2002 = vmatpush1.bf16.msra.mxu0 %v2697_v24 }
  0xca   :  { %2003 = vmatprep.subr.bf16.mxu0 %v2702_v36  ;;  %2043 = vmatpush1.bf16.msra.mxu1 %v2757_v47 }
  0xcb   :  { %2044 = vmatprep.subr.bf16.mxu1 %v2765_v52 }
  0xcd   :  { %2004 = vmatpush1.bf16.msra.mxu0 %v2700_v17 }
  0xce   :  { %2005 = vmatprep.subr.bf16.mxu0 %v2705_v40  ;;  %2045 = vmatpush1.bf16.msra.mxu1 %v2763_v51 }
  0xcf   :  { %2046 = vmatprep.subr.bf16.mxu1 %v2771_v56 }
  0xd1   :  { %2006 = vmatpush1.bf16.msra.mxu0 %v2703_v41 }
  0xd2   :  { %2007 = vmatprep.subr.bf16.mxu0 %v2708_v45  ;;  %2047 = vmatpush1.bf16.msra.mxu1 %v2769_v55 }
  0xd3   :  { %2048 = vmatprep.subr.bf16.mxu1 %v2777_v60  ;;  %v2744_v60 = vld [vmem:[#allocation7 + $0xcc] ss:$16 sps:$4 sm:$0xff]  }
  0xd5   :  { %2008 = vmatpush1.bf16.msra.mxu0 %v2706_v46 }
  0xd6   :  { %2009 = vmatprep.subr.bf16.mxu0 %v2711_v49  ;;  %2049 = vmatpush1.bf16.msra.mxu1 %v2775_v59 }
  0xd7   :  { %2050 = vmatprep.subr.bf16.mxu1 %v2783_v0  ;;  %v2756_v0 = vld [vmem:[#allocation7 + $0x8c] ss:$16 sps:$4 sm:$0xff]  }
  0xd9   :  { %2010 = vmatpush1.bf16.msra.mxu0 %v2709_v50 }
  0xda   :  { %2011 = vmatprep.subr.bf16.mxu0 %v2714_v53  ;;  %2051 = vmatpush1.bf16.msra.mxu1 %v2781_v63  ;;  %v2748_v63 = vld [vmem:[#allocation7 + $0xa8] ss:$16 sps:$4 sm:$0xff]  }
  0xdb   :  { %2052 = vmatprep.subr.bf16.mxu1 %v2789_v4  ;;  %v2768_v4 = vld [vmem:[#allocation7 + $0x4c] ss:$16 sps:$4 sm:$0xff]  }
  0xdd   :  { %2012 = vmatpush2.bf16.msra.mxu0 %v2712_v54 }
  0xde   :  { %2013 = vmatprep.subr.bf16.mxu0 %v2717_v57  ;;  %2053 = vmatpush2.bf16.msra.mxu1 %v2787_v3  ;;  %v2760_v3 = vld [vmem:[#allocation7 + $0x68] ss:$16 sps:$4 sm:$0xff]  }
  0xdf   :  { %2054 = vmatprep.subr.bf16.mxu1 %v2795_v8  ;;  %v2780_v8 = vld [vmem:[#allocation7 + $0xc] ss:$16 sps:$4 sm:$0xff]  }
  0xe1   :  { %2014 = vmatpush2.bf16.msra.mxu0 %v2715_v58  ;;  %v2736_v58 = vld [vmem:[#allocation7 + $0xe8] ss:$16 sps:$4 sm:$0xff]  }
  0xe2   :  { %2015 = vmatprep.subr.bf16.mxu0 %v2720_v61  ;;  %2055 = vmatpush2.bf16.msra.mxu1 %v2793_v7  ;;  %v2742_v61 = vld [vmem:[#allocation7 + $0xc8] ss:$16 sps:$4 sm:$0xff]  }
  0xe3   :  { %2056 = vmatprep.subr.bf16.mxu1 %v2801_v13  ;;  %v2772_v7 = vld [vmem:[#allocation7 + $0x28] ss:$16 sps:$4 sm:$0xff]   ;;  %v2792_v13 = vld [vmem:[#allocation7 + $0x1cc] ss:$16 sps:$4 sm:$0xff]  }
  0xe5   :  { %2016 = vmatpush2.bf16.msra.mxu0 %v2718_v62  ;;  %v2750_v62 = vld [vmem:[#allocation7 + $0xac] ss:$16 sps:$4 sm:$0xff]  }
  0xe6   :  { %2017 = vmatprep.subr.bf16.mxu0 %v2723_v1  ;;  %2057 = vmatpush2.bf16.msra.mxu1 %v2799_v12  ;;  %v2754_v1 = vld [vmem:[#allocation7 + $0x88] ss:$16 sps:$4 sm:$0xff]  }
  0xe7   :  { %2058 = vmatprep.subr.bf16.mxu1 %v2807_v18  ;;  %v2784_v12 = vld [vmem:[#allocation7 + $0x1e8] ss:$16 sps:$4 sm:$0xff]   ;;  %v2804_v18 = vld [vmem:[#allocation7 + $0x18c] ss:$16 sps:$4 sm:$0xff]  }
  0xe9   :  { %2018 = vmatpush2.bf16.msra.mxu0 %v2721_v2  ;;  %v2762_v2 = vld [vmem:[#allocation7 + $0x6c] ss:$16 sps:$4 sm:$0xff]  }
  0xea   :  { %2019 = vmatprep.subr.bf16.mxu0 %v2726_v5  ;;  %2059 = vmatpush2.bf16.msra.mxu1 %v2805_v16  ;;  %v2766_v5 = vld [vmem:[#allocation7 + $0x48] ss:$16 sps:$4 sm:$0xff]  }
  0xeb   :  { %2060 = vmatprep.subr.bf16.mxu1 %v2813_v22  ;;  %v2796_v16 = vld [vmem:[#allocation7 + $0x1a8] ss:$16 sps:$4 sm:$0xff]  }
  0xed   :  { %2020 = vmatpush2.bf16.msra.mxu0 %v2724_v6  ;;  %v2774_v6 = vld [vmem:[#allocation7 + $0x2c] ss:$16 sps:$4 sm:$0xff]  }
  0xee   :  { %2021 = vmatprep.subr.bf16.mxu0 %v2729_v9  ;;  %2061 = vmatpush2.bf16.msra.mxu1 %v2811_v23  ;;  %v2778_v9 = vld [vmem:[#allocation7 + $0x8] ss:$16 sps:$4 sm:$0xff]  }
  0xef   :  { %2062 = vmatprep.subr.bf16.mxu1 %v2819_v25  ;;  %v2808_v23 = vld [vmem:[#allocation7 + $0x168] ss:$16 sps:$4 sm:$0xff]   ;;  %v3084_v25 = vsub.s32 3, %v3026_v42 }
  0xf1   :  { %2022 = vmatpush2.bf16.msra.mxu0 %v2727_v11  ;;  %v2786_v11 = vld [vmem:[#allocation7 + $0x1ec] ss:$16 sps:$4 sm:$0xff]  }
  0xf2   :  { %2023 = vmatprep.subr.bf16.mxu0 %v2732_v14  ;;  %2063 = vmatpush2.bf16.msra.mxu1 %v2817_v27  ;;  %v2790_v14 = vld [vmem:[#allocation7 + $0x1c8] ss:$16 sps:$4 sm:$0xff]   ;;  %v2816_v27 = vld [vmem:[#allocation7 + $0x14c] ss:$16 sps:$4 sm:$0xff]  }
  0xf3   :  { %2064 = vmatprep.subr.bf16.mxu1 %v2825_v28 }
  0xf5   :  { %2024 = vmatpush2.bf16.msra.mxu0 %v2730_v15  ;;  %v2798_v15 = vld [vmem:[#allocation7 + $0x1ac] ss:$16 sps:$4 sm:$0xff]  }
  0xf6   :  { %2025 = vmatprep.subr.bf16.mxu0 %v2735_v19  ;;  %2065 = vmatpush2.bf16.msra.mxu1 %v2823_v29  ;;  %v2802_v19 = vld [vmem:[#allocation7 + $0x188] ss:$16 sps:$4 sm:$0xff]  }
  0xf7   :  { %2066 = vmatprep.subr.bf16.mxu1 %v2831_v30 }
  0xf9   :  { %2026 = vmatpush2.bf16.msra.mxu0 %v2733_v20  ;;  %v2810_v20 = vld [vmem:[#allocation7 + $0x16c] ss:$16 sps:$4 sm:$0xff]  }
  0xfa   :  { %2077 = vmatprep.subr.bf16.mxu0 %v2738_v21  ;;  %2067 = vmatpush2.bf16.msra.mxu1 %v2829_v31  ;;  %v3081_v21 = vsub.s32 2, %v3026_v42  ;;  %v2814_v31 = vld [vmem:[#allocation7 + $0x148] ss:$16 sps:$4 sm:$0xff]  }
  0xfb   :  { %2118 = vmatprep.subr.bf16.mxu1 %v2834_v32  ;;  %v227_v32 = vrot.slane %v3068_v10, %v3084_v25 }
  0xfc   :  { %v223_v29 = vrot.slane %v3068_v10, %v3081_v21  ;;  %v2826_v10 = vld [vmem:[#allocation7 + $0x108] ss:$16 sps:$4 sm:$0xff]  }
 0x134   :  { %v977_v24 = vpop.f32.mrf.mxu0 }
 0x135   :  { %v1018_v36 = vpop.f32.mrf.mxu1  ;;  %v978_v39 = vadd.f32 %v977_v24, %v215_v35  ;;  %v2822_v35 = vld [vmem:[#allocation7 + $0x12c] ss:$16 sps:$4 sm:$0xff]  }
 0x136   :  { %v979_v38 = vpop.f32.mrf.mxu0 }
 0x137   :  { %v1020_v17 = vpop.f32.mrf.mxu1  ;;  %v980_v41 = vadd.f32 %v979_v38, %v219_v37  ;;  %v1019_v45 = vadd.f32 %v1018_v36, %v978_v39  ;;  %v2820_v38 = vld [vmem:[#allocation7 + $0x128] ss:$16 sps:$4 sm:$0xff]  }
 0x138   :  { %v981_v26 = vpop.f32.mrf.mxu0 }
 0x139   :  { %v1022_v40 = vpop.f32.mrf.mxu1  ;;  %v1021_v47 = vadd.f32 %v1020_v17, %v980_v41  ;;  %v2828_v26 = vld [vmem:[#allocation7 + $0x10c] ss:$16 sps:$4 sm:$0xff]  }
 0x13a   :  { %v982_v43 = vpop.f32.mrf.mxu0 }
 0x13b   :  { %v1023_v44 = vpop.f32.mrf.mxu1 }
 0x13c   :  { %v1059_v46 = vpop.f32.mrf.mxu0 }
 0x13d   :  { %v1060_v48 = vadd.f32 %v1059_v46, %v1019_v45 }
 0x13e   :  { %v1061_v49 = vpop.f32.mrf.mxu0 }
 0x13f   :  { %vm1189_vm2 = vcmp.gt.f32.partialorder %v1060_v48, 0.0  ;;  %v1193_v50 = vmul.f32 0.2, %v1060_v48  ;;  %v1062_v51 = vadd.f32 %v1061_v49, %v1021_v47 }
 0x140   :  { %v1063_v52 = vpop.f32.mrf.mxu0 }
 0x141   :  { %vm1190_vm3 = vcmp.gt.f32.partialorder %v1062_v51, 0.0  ;;  %v1194_v53 = vmul.f32 0.2, %v1062_v51  ;;  %v1197_v54 = vsel %vm1189_vm2, %v1060_v48, %v1193_v50 }
 0x142   :  { %v1064_v55 = vpop.f32.mrf.mxu0  ;;  %v3077_v59 = vpack.c.bf16 %v1197_v54, %v1197_v54 }
 0x143   :  { %v1198_v56 = vsel %vm1190_vm3, %v1062_v51, %v1194_v53  ;;  %v2832_v55 = vld [vmem:[#allocation7 + $0x2e8] ss:$16 sps:$4 sm:$0xff]  }
 0x144   :  { %v1202_v57 = vpack.c.bf16 %v1198_v56, %v1198_v56 }
 0x146   :  { %2027 = vmatprep.mubr.bf16.mxu0 %v1202_v57 }
 0x147   :  { %2028 = vmatmul.mubr.bf16.vlgmr.msra.gmra.mxu0 %v3077_v59 }
 0x148   :  { %2078 = vmatpush1.bf16.msra.mxu0 %v2736_v58  ;;  %2109 = vmatprep.mubr.bf16.mxu0 %v1202_v57  ;;  %v2837_v57 = vld [vmem:[#allocation7 + $0x2cc] ss:$16 sps:$4 sm:$0xff]   ;;  %v2835_v58 = vld [vmem:[#allocation7 + $0x2c8] ss:$16 sps:$4 sm:$0xff]  }
 0x149   :  { %2079 = vmatprep.subr.bf16.mxu0 %v2744_v60  ;;  %v2840_v60 = vld [vmem:[#allocation7 + $0x2ac] ss:$16 sps:$4 sm:$0xff]  }
 0x14c   :  { %2080 = vmatpush1.bf16.msra.mxu0 %v2742_v61  ;;  %v2838_v61 = vld [vmem:[#allocation7 + $0x2a8] ss:$16 sps:$4 sm:$0xff]  }
 0x14d   :  { %2081 = vmatprep.subr.bf16.mxu0 %v2750_v62  ;;  %v2843_v62 = vld [vmem:[#allocation7 + $0x28c] ss:$16 sps:$4 sm:$0xff]  }
 0x150   :  { %2082 = vmatpush1.bf16.msra.mxu0 %v2748_v63  ;;  %v2841_v63 = vld [vmem:[#allocation7 + $0x288] ss:$16 sps:$4 sm:$0xff]  }
 0x151   :  { %2083 = vmatprep.subr.bf16.mxu0 %v2756_v0  ;;  %v2846_v0 = vld [vmem:[#allocation7 + $0x26c] ss:$16 sps:$4 sm:$0xff]  }
 0x154   :  { %2084 = vmatpush1.bf16.msra.mxu0 %v2754_v1  ;;  %v2844_v1 = vld [vmem:[#allocation7 + $0x268] ss:$16 sps:$4 sm:$0xff]  }
 0x155   :  { %2085 = vmatprep.subr.bf16.mxu0 %v2762_v2  ;;  %v2847_v2 = vld [vmem:[#allocation7 + $0x248] ss:$16 sps:$4 sm:$0xff]  }
 0x158   :  { %2086 = vmatpush1.bf16.msra.mxu0 %v2760_v3  ;;  %v2852_v3 = vld [vmem:[#allocation7 + $0x22c] ss:$16 sps:$4 sm:$0xff]  }
 0x159   :  { %2087 = vmatprep.subr.bf16.mxu0 %v2768_v4  ;;  %v2850_v4 = vld [vmem:[#allocation7 + $0x228] ss:$16 sps:$4 sm:$0xff]  }
 0x15c   :  { %2088 = vmatpush1.bf16.msra.mxu0 %v2766_v5  ;;  %v2855_v5 = vld [vmem:[#allocation7 + $0x20c] ss:$16 sps:$4 sm:$0xff]  }
 0x15d   :  { %2089 = vmatprep.subr.bf16.mxu0 %v2774_v6  ;;  %v2853_v6 = vld [vmem:[#allocation7 + $0x208] ss:$16 sps:$4 sm:$0xff]  }
 0x160   :  { %2090 = vmatpush1.bf16.msra.mxu0 %v2772_v7  ;;  %v2858_v7 = vld [vmem:[#allocation7 + $0x3ec] ss:$16 sps:$4 sm:$0xff]  }
 0x161   :  { %2091 = vmatprep.subr.bf16.mxu0 %v2780_v8  ;;  %v2856_v8 = vld [vmem:[#allocation7 + $0x3e8] ss:$16 sps:$4 sm:$0xff]  }
 0x164   :  { %2092 = vmatpush1.bf16.msra.mxu0 %v2778_v9  ;;  %v2861_v9 = vld [vmem:[#allocation7 + $0x3cc] ss:$16 sps:$4 sm:$0xff]  }
 0x165   :  { %2093 = vmatprep.subr.bf16.mxu0 %v2786_v11  ;;  %v2859_v11 = vld [vmem:[#allocation7 + $0x3c8] ss:$16 sps:$4 sm:$0xff]  }
 0x168   :  { %2094 = vmatpush2.bf16.msra.mxu0 %v2784_v12  ;;  %v2864_v12 = vld [vmem:[#allocation7 + $0x3ac] ss:$16 sps:$4 sm:$0xff]  }
 0x169   :  { %2095 = vmatprep.subr.bf16.mxu0 %v2792_v13  ;;  %v2862_v13 = vld [vmem:[#allocation7 + $0x3a8] ss:$16 sps:$4 sm:$0xff]  }
 0x16c   :  { %2096 = vmatpush2.bf16.msra.mxu0 %v2790_v14  ;;  %v2867_v14 = vld [vmem:[#allocation7 + $0x38c] ss:$16 sps:$4 sm:$0xff]  }
 0x16d   :  { %2097 = vmatprep.subr.bf16.mxu0 %v2798_v15  ;;  %v2865_v15 = vld [vmem:[#allocation7 + $0x388] ss:$16 sps:$4 sm:$0xff]  }
 0x170   :  { %2098 = vmatpush2.bf16.msra.mxu0 %v2796_v16  ;;  %v2870_v16 = vld [vmem:[#allocation7 + $0x36c] ss:$16 sps:$4 sm:$0xff]  }
 0x171   :  { %2099 = vmatprep.subr.bf16.mxu0 %v2804_v18  ;;  %v2868_v18 = vld [vmem:[#allocation7 + $0x368] ss:$16 sps:$4 sm:$0xff]  }
 0x174   :  { %2100 = vmatpush2.bf16.msra.mxu0 %v2802_v19  ;;  %v2873_v19 = vld [vmem:[#allocation7 + $0x34c] ss:$16 sps:$4 sm:$0xff]  }
 0x175   :  { %v1100_v22 = vpop.f32.mrf.mxu1  ;;  %2101 = vmatprep.subr.bf16.mxu0 %v2810_v20  ;;  %v2871_v20 = vld [vmem:[#allocation7 + $0x348] ss:$16 sps:$4 sm:$0xff]  }
 0x176   :  { %v1101_v36 = vadd.f32 %v1100_v22, %v223_v29  ;;  %v2876_v22 = vld [vmem:[#allocation7 + $0x32c] ss:$16 sps:$4 sm:$0xff]  }
 0x177   :  { %v1102_v28 = vpop.f32.mrf.mxu1 }
 0x178   :  { %2102 = vmatpush2.bf16.msra.mxu0 %v2808_v23  ;;  %v1103_v17 = vadd.f32 %v1102_v28, %v227_v32  ;;  %v2874_v23 = vld [vmem:[#allocation7 + $0x328] ss:$16 sps:$4 sm:$0xff]  }
 0x179   :  { %v1104_v30 = vpop.f32.mrf.mxu1  ;;  %2103 = vmatprep.subr.bf16.mxu0 %v2816_v27  ;;  %v2879_v27 = vld [vmem:[#allocation7 + $0x30c] ss:$16 sps:$4 sm:$0xff]   ;;  %v2877_v28 = vld [vmem:[#allocation7 + $0x308] ss:$16 sps:$4 sm:$0xff]  }
 0x17b   :  { %v1105_v24 = vpop.f32.mrf.mxu1 }
 0x17c   :  { %v1141_v37 = vpop.f32.mrf.mxu0  ;;  %2104 = vmatpush2.bf16.msra.mxu0 %v2814_v31 }
 0x17d   :  { %v1182_v42 = vpop.f32.mrf.mxu1  ;;  %v1142_v39 = vadd.f32 %v1141_v37, %v1101_v36  ;;  %2105 = vmatprep.subr.bf16.mxu0 %v2822_v35  ;;  %v1333_v35 = vld [vmem:[%s3120_s4] sm:$0xf] }
 0x17e   :  { %v1143_v40 = vpop.f32.mrf.mxu0  ;;  %v1338_v24 = vrot.slane %v1333_v35, %v3063_v33  ;;  %v1342_v36 = vrot.slane %v1333_v35, %v3071_v34 }
 0x17f   :  { %v1184_v41 = vpop.f32.mrf.mxu1  ;;  %v1183_v43 = vadd.f32 %v1182_v42, %v1142_v39  ;;  %v1144_v44 = vadd.f32 %v1143_v40, %v1103_v17 }
 0x180   :  { %v1145_v45 = vpop.f32.mrf.mxu0  ;;  %2106 = vmatpush2.bf16.msra.mxu0 %v2820_v38  ;;  %v2171_v38 = vld [vmem:[#allocation8] sm:$0xf] }
 0x181   :  { %v1186_v46 = vpop.f32.mrf.mxu1  ;;  %vm1191_vm4 = vcmp.gt.f32.partialorder %v1183_v43, 0.0  ;;  %v1195_v47 = vmul.f32 0.2, %v1183_v43  ;;  %v1185_v48 = vadd.f32 %v1184_v41, %v1144_v44  ;;  %2107 = vmatprep.subr.bf16.mxu0 %v2828_v26  ;;  %v2176_v41 = vrot.slane %v2171_v38, %v3063_v33 }
 0x182   :  { %v1146_v49 = vpop.f32.mrf.mxu0 }
 0x183   :  { %v1187_v50 = vpop.f32.mrf.mxu1  ;;  %vm1192_vm5 = vcmp.gt.f32.partialorder %v1185_v48, 0.0  ;;  %v1196_v51 = vmul.f32 0.2, %v1185_v48  ;;  %v1199_v52 = vsel %vm1191_vm4, %v1183_v43, %v1195_v47 }
 0x184   :  { %2108 = vmatpush2.bf16.msra.mxu0 %v2826_v10  ;;  %v3090_v56 = vpack.c.bf16 %v1199_v52, %v1199_v52  ;;  %v2180_v10 = vrot.slane %v2171_v38, %v3071_v34 }
 0x185   :  { %v1200_v53 = vsel %vm1192_vm5, %v1185_v48, %v1196_v51 }
 0x186   :  { %v1204_v54 = vpack.c.bf16 %v1200_v53, %v1200_v53 }
 0x187   :  { %2110 = vmatmul.mubr.bf16.vlgmr.msra.gmra.mxu0 %v3077_v59  ;;  %v2849_v59 = vld [vmem:[#allocation7 + $0x24c] ss:$16 sps:$4 sm:$0xff]  }
 0x188   :  { %2068 = vmatprep.mubr.bf16.mxu1 %v1204_v54 }
 0x189   :  { %2069 = vmatmul.mubr.bf16.vlgmr.msra.gmra.mxu1 %v3090_v56 }
 0x18a   :  { %2119 = vmatpush1.bf16.msra.mxu1 %v2832_v55  ;;  %2150 = vmatprep.mubr.bf16.mxu1 %v1204_v54 }
 0x18b   :  { %2120 = vmatprep.subr.bf16.mxu1 %v2837_v57  ;;  %v1346_v57 = vrot.slane %v1333_v35, %v3081_v21 }
 0x18e   :  { %2121 = vmatpush1.bf16.msra.mxu1 %v2835_v58  ;;  %v1350_v58 = vrot.slane %v1333_v35, %v3084_v25 }
 0x18f   :  { %2122 = vmatprep.subr.bf16.mxu1 %v2840_v60 }
 0x192   :  { %2123 = vmatpush1.bf16.msra.mxu1 %v2838_v61 }
 0x193   :  { %2124 = vmatprep.subr.bf16.mxu1 %v2843_v62 }
 0x196   :  { %2125 = vmatpush1.bf16.msra.mxu1 %v2841_v63 }
 0x197   :  { %2126 = vmatprep.subr.bf16.mxu1 %v2846_v0  ;;  %v2184_v0 = vrot.slane %v2171_v38, %v3081_v21  ;;  %v2208_v21 = vstv %s3122_s6 }
 0x19a   :  { %2127 = vmatpush1.bf16.msra.mxu1 %v2844_v1 }
 0x19b   :  { %2128 = vmatprep.subr.bf16.mxu1 %v2849_v59 }
 0x19e   :  { %2129 = vmatpush1.bf16.msra.mxu1 %v2847_v2 }
 0x19f   :  { %2130 = vmatprep.subr.bf16.mxu1 %v2852_v3  ;;  %v2188_v3 = vrot.slane %v2171_v38, %v3084_v25 }
 0x1a2   :  { %2131 = vmatpush1.bf16.msra.mxu1 %v2850_v4 }
 0x1a3   :  { %2132 = vmatprep.subr.bf16.mxu1 %v2855_v5 }
 0x1a6   :  { %2133 = vmatpush1.bf16.msra.mxu1 %v2853_v6 }
 0x1a7   :  { %2134 = vmatprep.subr.bf16.mxu1 %v2858_v7 }
 0x1aa   :  { %2135 = vmatpush2.bf16.msra.mxu1 %v2856_v8 }
 0x1ab   :  { %2136 = vmatprep.subr.bf16.mxu1 %v2861_v9 }
 0x1ae   :  { %2137 = vmatpush2.bf16.msra.mxu1 %v2859_v11 }
 0x1af   :  { %2138 = vmatprep.subr.bf16.mxu1 %v2864_v12 }
 0x1b2   :  { %2139 = vmatpush2.bf16.msra.mxu1 %v2862_v13 }
 0x1b3   :  { %2140 = vmatprep.subr.bf16.mxu1 %v2867_v14 }
 0x1b6   :  { %2141 = vmatpush2.bf16.msra.mxu1 %v2865_v15 }
 0x1b7   :  { %2142 = vmatprep.subr.bf16.mxu1 %v2870_v16 }
 0x1ba   :  { %2143 = vmatpush2.bf16.msra.mxu1 %v2868_v18 }
 0x1bb   :  { %2144 = vmatprep.subr.bf16.mxu1 %v2873_v19 }
 0x1be   :  { %2145 = vmatpush2.bf16.msra.mxu1 %v2871_v20 }
 0x1bf   :  { %2146 = vmatprep.subr.bf16.mxu1 %v2876_v22 }
 0x1c2   :  { %2147 = vmatpush2.bf16.msra.mxu1 %v2874_v23 }
 0x1c3   :  { %2148 = vmatprep.subr.bf16.mxu1 %v2879_v27 }
 0x1c6   :  { %2149 = vmatpush2.bf16.msra.mxu1 %v2877_v28 }
 0x1c9   :  { %2151 = vmatmul.mubr.bf16.vlgmr.msra.gmra.mxu1 %v3090_v56 }
 0x207   :  { %v2029_v29 = vpop.f32.mrf.mxu0 }
 0x208   :  { %v2030_v42 = vadd.f32 %v2029_v29, %v1338_v24 }
 0x209   :  { %v2031_v30 = vpop.f32.mrf.mxu0 }
 0x20a   :  { %v2032_v26 = vadd.f32 %v2031_v30, %v1342_v36 }
 0x20b   :  { %v2033_v31 = vpop.f32.mrf.mxu0 }
 0x20d   :  { %v2034_v32 = vpop.f32.mrf.mxu0 }
 0x247   :  { %v2111_v37 = vpop.f32.mrf.mxu0 }
 0x248   :  { %v2112_v34 = vadd.f32 %v2111_v37, %v1346_v57 }
 0x249   :  { %v2070_v17 = vpop.f32.mrf.mxu1  ;;  %v2113_v39 = vpop.f32.mrf.mxu0 }
 0x24a   :  { %v2071_v40 = vadd.f32 %v2070_v17, %v2030_v42  ;;  %v2114_v61 = vadd.f32 %v2113_v39, %v1350_v58 }
 0x24b   :  { %v2072_v43 = vpop.f32.mrf.mxu1  ;;  %v2115_v44 = vpop.f32.mrf.mxu0 }
 0x24c   :  { %vm2159_vm6 = vcmp.gt.f32.partialorder %v2071_v40, 0.0  ;;  %v2163_v45 = vmul.f32 0.2, %v2071_v40  ;;  %v2073_v46 = vadd.f32 %v2072_v43, %v2032_v26 }
 0x24d   :  { %v2074_v47 = vpop.f32.mrf.mxu1  ;;  %v2116_v48 = vpop.f32.mrf.mxu0 }
 0x24e   :  { %v2167_v49 = vsel %vm2159_vm6, %v2071_v40, %v2163_v45  ;;  %vm2160_vm7 = vcmp.gt.f32.partialorder %v2073_v46, 0.0  ;;  %v2164_v50 = vmul.f32 0.2, %v2073_v46 }
 0x24f   :  { %v2193_v51 = vmul.f32 %v2176_v41, %v2167_v49  ;;  %v2075_v52 = vpop.f32.mrf.mxu1 }
 0x250   :  { %v2168_v53 = vsel %vm2160_vm7, %v2073_v46, %v2164_v50 }
 0x251   :  { %v2194_v54 = vmul.f32 %v2180_v10, %v2168_v53  ;;  %v2198_v55 = vsel %vm2197_vm8, %v2193_v51, 0.0 }
 0x253   :  { %v2199_v33 = vsel %vm2197_vm8, %v2194_v54, 0.0 }
 0x254   :  { %v2200_v56 = vadd.f32 %v2199_v33, %v2198_v55 }
 0x289   :  { %v2152_v60 = vpop.f32.mrf.mxu1 }
 0x28a   :  { %v2153_v62 = vadd.f32 %v2152_v60, %v2112_v34 }
 0x28b   :  { %v2154_v63 = vpop.f32.mrf.mxu1 }
 0x28c   :  { %vm2161_vm9 = vcmp.gt.f32.partialorder %v2153_v62, 0.0  ;;  %v2165_v1 = vmul.f32 0.2, %v2153_v62  ;;  %v2155_v59 = vadd.f32 %v2154_v63, %v2114_v61 }
 0x28d   :  { %v2156_v2 = vpop.f32.mrf.mxu1 }
 0x28e   :  { %v2169_v4 = vsel %vm2161_vm9, %v2153_v62, %v2165_v1  ;;  %vm2162_vm10 = vcmp.gt.f32.partialorder %v2155_v59, 0.0  ;;  %v2166_v5 = vmul.f32 0.2, %v2155_v59 }
 0x28f   :  { %v2157_v6 = vpop.f32.mrf.mxu1  ;;  %v2195_v7 = vmul.f32 %v2184_v0, %v2169_v4 }
 0x290   :  { %v2170_v8 = vsel %vm2162_vm10, %v2155_v59, %v2166_v5 }
 0x291   :  { %v2196_v9 = vmul.f32 %v2188_v3, %v2170_v8  ;;  %v2201_v11 = vsel %vm2197_vm8, %v2195_v7, 0.0 }
 0x292   :  { %v2202_v12 = vadd.f32 %v2201_v11, %v2200_v56 }
 0x293   :  { %v2203_v13 = vsel %vm2197_vm8, %v2196_v9, 0.0 }
 0x294   :  { %v2204_v14 = vadd.f32 %v2203_v13, %v2202_v12 }
 0x296   :  { %2205 = vadd.xlane.f32.xlu0 %v2204_v14 }
 0x31f   :  { %v2206_v15 = vpop.xlane.xlu0 %2205 }
 0x320   :  { %v2209_v25 = vadd.f32 %v2208_v21, %v2206_v15 }
 0x322   :  { %2211 = vst.msk [vmem:[%s3123_s7] sm:$0x3] %vm2210_vm11, %v2209_v25 }
 0x323   :  { %2216 = vsyncpa [#allocation4], 1 }
 0x324   :  { %2217 = vsyncpa [#allocation6], 1 }
 0x325   :  { %2218 = vsyncpa [#allocation9], 1 }

</bundles_post_ra>
